<compile_context>
chip_gen: v5e
topology: v5e:2x2
jax: 0.10.0
libtpu: 0.0.40
codegen_flags: <defaults>
</compile_context>

<pallas_src>
import jax
import jax.numpy as jnp
from jax.experimental import pallas as pl
from jax.experimental.pallas import tpu as pltpu


# ---------------------------------------------------------------------------
# Fused Pallas kernel
# ---------------------------------------------------------------------------

def gin_fused_kernel(a1_ref, a2_ref, x_ref,
                     w1_ref, b1_ref, w2_ref, b2_ref, bn1s_ref, bn1t_ref,
                     w3_ref, b3_ref, w4_ref, b4_ref,
                     g1_ref, g2_ref, w5_ref, b5_ref,
                     o_ref):
    x = x_ref[...]

    # ---- GINConv1: (1+eps1)*x + sum_neighbors(x) == A1' @ x  (fold on host) ----
    h = jnp.dot(a1_ref[...], x, preferred_element_type=jnp.float32)
    h = jnp.maximum(jnp.dot(h, w1_ref[...], preferred_element_type=jnp.float32)
                    + b1_ref[...], 0.0)
    h = jnp.maximum(jnp.dot(h, w2_ref[...], preferred_element_type=jnp.float32)
                    + b2_ref[...], 0.0)
    # BatchNorm1d(hidden) in eval mode: per-feature affine (exact; cannot be
    # folded into the preceding Linear because a ReLU sits between them).
    h = h * bn1s_ref[...] + bn1t_ref[...]

    # ---- GINConv2: aggregation with (1+eps2) folded into A2' diagonal ----
    h = jnp.dot(a2_ref[...], h, preferred_element_type=jnp.float32)
    h = jnp.maximum(jnp.dot(h, w3_ref[...], preferred_element_type=jnp.float32)
                    + b3_ref[...], 0.0)
    # conv2's BatchNorm affine is folded into (w4, b4) on the host — exact.

    # ---- lin1 + ReLU (F.dropout(p=0.0) is a no-op) ----
    h = jnp.maximum(jnp.dot(h, w4_ref[...], preferred_element_type=jnp.float32)
                    + b4_ref[...], 0.0)

    # ---- train-edge endpoint gather (one-hot matmuls), pair product, fc1 ----
    x1 = jnp.dot(g1_ref[...], h, preferred_element_type=jnp.float32)
    x2 = jnp.dot(g2_ref[...], h, preferred_element_type=jnp.float32)
    o_ref[...] = jnp.dot(x1 * x2, w5_ref[...],
                         preferred_element_type=jnp.float32) + b5_ref[...]


# ---------------------------------------------------------------------------
# pallas_call wrapper (no grid: whole working set is a few hundred KiB of VMEM)
# ---------------------------------------------------------------------------

def _vmem():
    return pl.BlockSpec(memory_space=pltpu.MemorySpace.VMEM)


def gin_fused(a1, a2, x, w1, b1, w2, b2, bn1s, bn1t, w3, b3, w4, b4, g1, g2,
              w5, b5):
    t = g1.shape[0]
    c_pad = w5.shape[1]
    args = (a1, a2, x, w1, b1, w2, b2, bn1s, bn1t, w3, b3, w4, b4, g1, g2, w5, b5)
    return pl.pallas_call(
        gin_fused_kernel,
        out_shape=jax.ShapeDtypeStruct((t, c_pad), jnp.float32),
        in_specs=[_vmem()] * len(args),
        out_specs=_vmem(),
    )(*args)


# ---------------------------------------------------------------------------
# Model: parameter construction + forward
# ---------------------------------------------------------------------------

def init_params(key, in_dim=128, hidden=128, out_dim=64, out_pad=128):
    ks = jax.random.split(key, 5)

    def lin(k, fan_in, fan_out):
        bound = 1.0 / jnp.sqrt(fan_in)
        kw, kb = jax.random.split(k)
        w = jax.random.uniform(kw, (fan_in, fan_out), jnp.float32, -bound, bound)
        b = jax.random.uniform(kb, (1, fan_out), jnp.float32, -bound, bound)
        return w, b

    bn_eps = 1e-5
    # BatchNorm1d eval mode with default stats (gamma=1, beta=0, mean=0, var=1).
    bn_scale = jnp.full((1, hidden), 1.0 / jnp.sqrt(1.0 + bn_eps), jnp.float32)
    bn_shift = jnp.zeros((1, hidden), jnp.float32)

    p = {}
    p["conv1_w1"], p["conv1_b1"] = lin(ks[0], in_dim, hidden)
    p["conv1_w2"], p["conv1_b2"] = lin(ks[1], hidden, hidden)
    p["conv1_eps"] = jnp.float32(0.0)                 # train_eps init = 0
    p["conv1_bn_scale"], p["conv1_bn_shift"] = bn_scale, bn_shift

    p["conv2_w"], p["conv2_b"] = lin(ks[2], hidden, hidden)
    p["conv2_eps"] = jnp.float32(0.0)
    p["conv2_bn_scale"], p["conv2_bn_shift"] = bn_scale, bn_shift

    p["lin1_w"], p["lin1_b"] = lin(ks[3], hidden, hidden)

    # fc1: zero-pad the output dim to 128 lanes so the kernel's store is
    # lane-dense; the host slices back to out_dim.
    w5, b5 = lin(ks[4], hidden, out_dim)
    p["fc1_w"] = jnp.pad(w5, ((0, 0), (0, out_pad - out_dim)))
    p["fc1_b"] = jnp.pad(b5, ((0, 0), (0, out_pad - out_dim)))
    return p


def gin_forward(params, x, edge_index, train_edge_index, out_dim=64):
    n = x.shape[0]
    src, dst = edge_index[0], edge_index[1]

    # Glue: dense adjacency with agg[dst] = sum over edges of x[src]; the
    # GINConv self term (1+eps)*x is folded into the diagonal so the in-kernel
    # aggregation is a single MXU matmul (no separate (1+eps)*x + agg pass).
    # TODO(synk): for large graphs, tile A over a grid and cast to bf16 instead
    # of keeping a dense f32 NxN matrix resident in VMEM.
    adj = jnp.zeros((n, n), jnp.float32).at[dst, src].add(1.0)
    eye = jnp.eye(n, dtype=jnp.float32)
    a1 = adj + (1.0 + params["conv1_eps"]) * eye
    a2 = adj + (1.0 + params["conv2_eps"]) * eye

    # Fold conv2's BatchNorm affine into lin1 (exact: lin1 directly consumes
    # BN2's output, no nonlinearity in between):
    #   (h*s2 + t2) @ W4 + b4  ==  h @ (diag(s2) W4) + (t2 @ W4 + b4)
    s2 = params["conv2_bn_scale"]          # (1, H)
    t2 = params["conv2_bn_shift"]          # (1, H)
    w4f = s2.reshape(-1, 1) * params["lin1_w"]
    b4f = t2 @ params["lin1_w"] + params["lin1_b"]

    # Glue: endpoint gather expressed as one-hot matmuls so it runs on the MXU
    # inside the fused kernel instead of as a separate XLA gather.
    g1 = jax.nn.one_hot(train_edge_index[0], n, dtype=jnp.float32)
    g2 = jax.nn.one_hot(train_edge_index[1], n, dtype=jnp.float32)

    out = gin_fused(a1, a2, x,
                    params["conv1_w1"], params["conv1_b1"],
                    params["conv1_w2"], params["conv1_b2"],
                    params["conv1_bn_scale"], params["conv1_bn_shift"],
                    params["conv2_w"], params["conv2_b"],
                    w4f, b4f, g1, g2,
                    params["fc1_w"], params["fc1_b"])
    return out[:, :out_dim]


# ---------------------------------------------------------------------------
# Main
# ---------------------------------------------------------------------------

if __name__ == "__main__":
    key = jax.random.PRNGKey(0)
    k_x, k_e, k_t, k_p = jax.random.split(key, 4)

    N = 16          # number of graph nodes
    F_IN = 128      # GIN input feature dim (fixed by Linear(128, hidden))
    HIDDEN = 128    # lane-aligned small stand-in for hidden=512
    E = 32          # number of graph edges
    T = 8           # number of training edges
    OUT = 64        # fc1 output dim
    OUT_PAD = 128   # lane-dense padded fc1 output dim inside the kernel

    x = jax.random.normal(k_x, (N, F_IN), jnp.float32)
    edge_index = jax.random.randint(k_e, (2, E), 0, N, jnp.int32)
    train_edge_index = jax.random.randint(k_t, (2, T), 0, N, jnp.int32)

    params = init_params(k_p, in_dim=F_IN, hidden=HIDDEN, out_dim=OUT,
                         out_pad=OUT_PAD)

    fwd = jax.jit(lambda p, xx, ei, tei: gin_forward(p, xx, ei, tei, out_dim=OUT))
    out = fwd(params, x, edge_index, train_edge_index)
    out = jax.block_until_ready(out)
    assert out.shape == (T, OUT), out.shape
    print("KERNEL_OK")
</pallas_src>

<mosaic_0001>
module attributes {stable_mosaic.version = 11 : i64} {
  func.func @gin_fused_kernel(%arg0: memref<16x16xf32, #tpu.memory_space<vmem>>, %arg1: memref<16x16xf32, #tpu.memory_space<vmem>>, %arg2: memref<16x128xf32, #tpu.memory_space<vmem>>, %arg3: memref<128x128xf32, #tpu.memory_space<vmem>>, %arg4: memref<1x128xf32, #tpu.memory_space<vmem>>, %arg5: memref<128x128xf32, #tpu.memory_space<vmem>>, %arg6: memref<1x128xf32, #tpu.memory_space<vmem>>, %arg7: memref<1x128xf32, #tpu.memory_space<vmem>>, %arg8: memref<1x128xf32, #tpu.memory_space<vmem>>, %arg9: memref<128x128xf32, #tpu.memory_space<vmem>>, %arg10: memref<1x128xf32, #tpu.memory_space<vmem>>, %arg11: memref<128x128xf32, #tpu.memory_space<vmem>>, %arg12: memref<1x128xf32, #tpu.memory_space<vmem>>, %arg13: memref<8x16xf32, #tpu.memory_space<vmem>>, %arg14: memref<8x16xf32, #tpu.memory_space<vmem>>, %arg15: memref<128x128xf32, #tpu.memory_space<vmem>>, %arg16: memref<1x128xf32, #tpu.memory_space<vmem>>, %arg17: memref<8x128xf32, #tpu.memory_space<vmem>>) attributes {dimension_semantics = [], scalar_prefetch = 0 : i64, scratch_operands = 0 : i64, tpu.core_type = #tpu.core_type<tc>} {
    %c0 = arith.constant 0 : index
    %c0_0 = arith.constant 0 : index
    %0 = vector.load %arg2[%c0, %c0_0] : memref<16x128xf32, #tpu.memory_space<vmem>>, vector<16x128xf32>
    %c0_1 = arith.constant 0 : index
    %c0_2 = arith.constant 0 : index
    %1 = vector.load %arg0[%c0_1, %c0_2] : memref<16x16xf32, #tpu.memory_space<vmem>>, vector<16x16xf32>
    %cst = arith.constant dense<0.000000e+00> : vector<16x128xf32>
    %2 = tpu.matmul %1, %0, %cst {dimension_numbers = #tpu.dot_dimension_numbers<[1], [0], [0], [1], [0, 0, 1, 1], [], []>} : vector<16x16xf32>, vector<16x128xf32>, vector<16x128xf32> -> vector<16x128xf32>
    %c0_3 = arith.constant 0 : index
    %c0_4 = arith.constant 0 : index
    %3 = vector.load %arg3[%c0_3, %c0_4] : memref<128x128xf32, #tpu.memory_space<vmem>>, vector<128x128xf32>
    %cst_5 = arith.constant dense<0.000000e+00> : vector<16x128xf32>
    %4 = tpu.matmul %2, %3, %cst_5 {dimension_numbers = #tpu.dot_dimension_numbers<[1], [0], [0], [1], [0, 0, 1, 1], [], []>} : vector<16x128xf32>, vector<128x128xf32>, vector<16x128xf32> -> vector<16x128xf32>
    %c0_6 = arith.constant 0 : index
    %c0_7 = arith.constant 0 : index
    %5 = vector.load %arg4[%c0_6, %c0_7] : memref<1x128xf32, #tpu.memory_space<vmem>>, vector<1x128xf32>
    %6 = vector.broadcast %5 : vector<1x128xf32> to vector<16x128xf32>
    %7 = arith.addf %4, %6 : vector<16x128xf32>
    %cst_8 = arith.constant 0.000000e+00 : f32
    %8 = vector.broadcast %cst_8 : f32 to vector<16x128xf32>
    %9 = arith.maximumf %7, %8 : vector<16x128xf32>
    %c0_9 = arith.constant 0 : index
    %c0_10 = arith.constant 0 : index
    %10 = vector.load %arg5[%c0_9, %c0_10] : memref<128x128xf32, #tpu.memory_space<vmem>>, vector<128x128xf32>
    %cst_11 = arith.constant dense<0.000000e+00> : vector<16x128xf32>
    %11 = tpu.matmul %9, %10, %cst_11 {dimension_numbers = #tpu.dot_dimension_numbers<[1], [0], [0], [1], [0, 0, 1, 1], [], []>} : vector<16x128xf32>, vector<128x128xf32>, vector<16x128xf32> -> vector<16x128xf32>
    %c0_12 = arith.constant 0 : index
    %c0_13 = arith.constant 0 : index
    %12 = vector.load %arg6[%c0_12, %c0_13] : memref<1x128xf32, #tpu.memory_space<vmem>>, vector<1x128xf32>
    %13 = vector.broadcast %12 : vector<1x128xf32> to vector<16x128xf32>
    %14 = arith.addf %11, %13 : vector<16x128xf32>
    %cst_14 = arith.constant 0.000000e+00 : f32
    %15 = vector.broadcast %cst_14 : f32 to vector<16x128xf32>
    %16 = arith.maximumf %14, %15 : vector<16x128xf32>
    %c0_15 = arith.constant 0 : index
    %c0_16 = arith.constant 0 : index
    %17 = vector.load %arg7[%c0_15, %c0_16] : memref<1x128xf32, #tpu.memory_space<vmem>>, vector<1x128xf32>
    %18 = vector.broadcast %17 : vector<1x128xf32> to vector<16x128xf32>
    %19 = arith.mulf %16, %18 : vector<16x128xf32>
    %c0_17 = arith.constant 0 : index
    %c0_18 = arith.constant 0 : index
    %20 = vector.load %arg8[%c0_17, %c0_18] : memref<1x128xf32, #tpu.memory_space<vmem>>, vector<1x128xf32>
    %21 = vector.broadcast %20 : vector<1x128xf32> to vector<16x128xf32>
    %22 = arith.addf %19, %21 : vector<16x128xf32>
    %c0_19 = arith.constant 0 : index
    %c0_20 = arith.constant 0 : index
    %23 = vector.load %arg1[%c0_19, %c0_20] : memref<16x16xf32, #tpu.memory_space<vmem>>, vector<16x16xf32>
    %cst_21 = arith.constant dense<0.000000e+00> : vector<16x128xf32>
    %24 = tpu.matmul %23, %22, %cst_21 {dimension_numbers = #tpu.dot_dimension_numbers<[1], [0], [0], [1], [0, 0, 1, 1], [], []>} : vector<16x16xf32>, vector<16x128xf32>, vector<16x128xf32> -> vector<16x128xf32>
    %c0_22 = arith.constant 0 : index
    %c0_23 = arith.constant 0 : index
    %25 = vector.load %arg9[%c0_22, %c0_23] : memref<128x128xf32, #tpu.memory_space<vmem>>, vector<128x128xf32>
    %cst_24 = arith.constant dense<0.000000e+00> : vector<16x128xf32>
    %26 = tpu.matmul %24, %25, %cst_24 {dimension_numbers = #tpu.dot_dimension_numbers<[1], [0], [0], [1], [0, 0, 1, 1], [], []>} : vector<16x128xf32>, vector<128x128xf32>, vector<16x128xf32> -> vector<16x128xf32>
    %c0_25 = arith.constant 0 : index
    %c0_26 = arith.constant 0 : index
    %27 = vector.load %arg10[%c0_25, %c0_26] : memref<1x128xf32, #tpu.memory_space<vmem>>, vector<1x128xf32>
    %28 = vector.broadcast %27 : vector<1x128xf32> to vector<16x128xf32>
    %29 = arith.addf %26, %28 : vector<16x128xf32>
    %cst_27 = arith.constant 0.000000e+00 : f32
    %30 = vector.broadcast %cst_27 : f32 to vector<16x128xf32>
    %31 = arith.maximumf %29, %30 : vector<16x128xf32>
    %c0_28 = arith.constant 0 : index
    %c0_29 = arith.constant 0 : index
    %32 = vector.load %arg11[%c0_28, %c0_29] : memref<128x128xf32, #tpu.memory_space<vmem>>, vector<128x128xf32>
    %cst_30 = arith.constant dense<0.000000e+00> : vector<16x128xf32>
    %33 = tpu.matmul %31, %32, %cst_30 {dimension_numbers = #tpu.dot_dimension_numbers<[1], [0], [0], [1], [0, 0, 1, 1], [], []>} : vector<16x128xf32>, vector<128x128xf32>, vector<16x128xf32> -> vector<16x128xf32>
    %c0_31 = arith.constant 0 : index
    %c0_32 = arith.constant 0 : index
    %34 = vector.load %arg12[%c0_31, %c0_32] : memref<1x128xf32, #tpu.memory_space<vmem>>, vector<1x128xf32>
    %35 = vector.broadcast %34 : vector<1x128xf32> to vector<16x128xf32>
    %36 = arith.addf %33, %35 : vector<16x128xf32>
    %cst_33 = arith.constant 0.000000e+00 : f32
    %37 = vector.broadcast %cst_33 : f32 to vector<16x128xf32>
    %38 = arith.maximumf %36, %37 : vector<16x128xf32>
    %c0_34 = arith.constant 0 : index
    %c0_35 = arith.constant 0 : index
    %39 = vector.load %arg13[%c0_34, %c0_35] : memref<8x16xf32, #tpu.memory_space<vmem>>, vector<8x16xf32>
    %cst_36 = arith.constant dense<0.000000e+00> : vector<8x128xf32>
    %40 = tpu.matmul %39, %38, %cst_36 {dimension_numbers = #tpu.dot_dimension_numbers<[1], [0], [0], [1], [0, 0, 1, 1], [], []>} : vector<8x16xf32>, vector<16x128xf32>, vector<8x128xf32> -> vector<8x128xf32>
    %c0_37 = arith.constant 0 : index
    %c0_38 = arith.constant 0 : index
    %41 = vector.load %arg14[%c0_37, %c0_38] : memref<8x16xf32, #tpu.memory_space<vmem>>, vector<8x16xf32>
    %cst_39 = arith.constant dense<0.000000e+00> : vector<8x128xf32>
    %42 = tpu.matmul %41, %38, %cst_39 {dimension_numbers = #tpu.dot_dimension_numbers<[1], [0], [0], [1], [0, 0, 1, 1], [], []>} : vector<8x16xf32>, vector<16x128xf32>, vector<8x128xf32> -> vector<8x128xf32>
    %43 = arith.mulf %40, %42 : vector<8x128xf32>
    %c0_40 = arith.constant 0 : index
    %c0_41 = arith.constant 0 : index
    %44 = vector.load %arg15[%c0_40, %c0_41] : memref<128x128xf32, #tpu.memory_space<vmem>>, vector<128x128xf32>
    %cst_42 = arith.constant dense<0.000000e+00> : vector<8x128xf32>
    %45 = tpu.matmul %43, %44, %cst_42 {dimension_numbers = #tpu.dot_dimension_numbers<[1], [0], [0], [1], [0, 0, 1, 1], [], []>} : vector<8x128xf32>, vector<128x128xf32>, vector<8x128xf32> -> vector<8x128xf32>
    %c0_43 = arith.constant 0 : index
    %c0_44 = arith.constant 0 : index
    %46 = vector.load %arg16[%c0_43, %c0_44] : memref<1x128xf32, #tpu.memory_space<vmem>>, vector<1x128xf32>
    %47 = vector.broadcast %46 : vector<1x128xf32> to vector<8x128xf32>
    %48 = arith.addf %45, %47 : vector<8x128xf32>
    %c0_45 = arith.constant 0 : index
    %c0_46 = arith.constant 0 : index
    %49 = vector.load %arg17[%c0_45, %c0_46] : memref<8x128xf32, #tpu.memory_space<vmem>>, vector<8x128xf32>
    tpu.vector_store %arg17[%c0_45, %c0_46], %48 {strides = array<i32>} : memref<8x128xf32, #tpu.memory_space<vmem>>, vector<8x128xf32>,
    return
  }
}

</mosaic_0001>

<bundles_post_ra>
// kernel: _lambda_.1
= control target key start
LH: loop header
LB: loop body
LE: loop exit
PB: predicated region body
PF: predicated region fallthrough
CT: control target
= control target key end

     0   :  { %s845_s0 = inlined_call_operand.vmem [shape: f32[16,16], index: 0, kind: input, shape index: {}]   ;;  %s846_s1 = inlined_call_operand.vmem [shape: f32[16,16], index: 1, kind: input, shape index: {}]   ;;  %s847_s2 = inlined_call_operand.vmem [shape: f32[16,128], index: 2, kind: input, shape index: {}]   ;;  %s848_s3 = inlined_call_operand.vmem [shape: f32[128,128], index: 3, kind: input, shape index: {}]   ;;  %s849_s4 = inlined_call_operand.vmem [shape: f32[1,128], index: 4, kind: input, shape index: {}]   ;;  %s850_s5 = inlined_call_operand.vmem [shape: f32[128,128], index: 5, kind: input, shape index: {}]   ;;  %s851_s6 = inlined_call_operand.vmem [shape: f32[1,128], index: 6, kind: input, shape index: {}]   ;;  %s852_s7 = inlined_call_operand.vmem [shape: f32[1,128], index: 7, kind: input, shape index: {}]   ;;  %s853_s8 = inlined_call_operand.vmem [shape: f32[1,128], index: 8, kind: input, shape index: {}]   ;;  %s854_s9 = inlined_call_operand.vmem [shape: f32[128,128], index: 9, kind: input, shape index: {}]   ;;  %s855_s10 = inlined_call_operand.vmem [shape: f32[1,128], index: 10, kind: input, shape index: {}]   ;;  %s856_s11 = inlined_call_operand.vmem [shape: f32[128,128], index: 11, kind: input, shape index: {}]   ;;  %s857_s12 = inlined_call_operand.vmem [shape: f32[1,128], index: 12, kind: input, shape index: {}]   ;;  %s858_s13 = inlined_call_operand.vmem [shape: f32[8,16], index: 13, kind: input, shape index: {}]   ;;  %s859_s14 = inlined_call_operand.vmem [shape: f32[8,16], index: 14, kind: input, shape index: {}]   ;;  %s860_s15 = inlined_call_operand.vmem [shape: f32[128,128], index: 15, kind: input, shape index: {}]   ;;  %s861_s16 = inlined_call_operand.vmem [shape: f32[1,128], index: 16, kind: input, shape index: {}]   ;;  %s862_s17 = inlined_call_operand.hbm [shape: f32[8,128], index: 17, kind: output, shape index: {}]  }
   0x1   :  { %865 = sst [smem:[#allocation5_spill]] %s845_s0 }
   0x2   :  { %866 = sst [smem:[#allocation6_spill]] %s846_s1 }
   0x3   :  { %v58_v0 = vld [vmem:[%s847_s2 + $0x8] sm:$0xff]  ;;  %v57_v1 = vld [vmem:[%s847_s2] sm:$0xff]  ;;  %s867_s0 = sld [smem:[#allocation5_spill]]  ;;  %vm61_vm0 = vcmask 130048   ;;  %v106_v3 = vld [vmem:[%s848_s3 + $0x78] sm:$0xff] }
   0x4   :  { %82 = vmatpush.msra.mxu3 %v58_v0  ;;  %v105_v4 = vld [vmem:[%s848_s3 + $0x70] sm:$0xff]  ;;  %111 = vmatpush.msra.mxu1 %v106_v3  ;;  %v104_v5 = vld [vmem:[%s848_s3 + $0x68] sm:$0xff]  ;;  %v103_v6 = vld [vmem:[%s848_s3 + $0x60] sm:$0xff] }
   0x5   :  { %v102_v7 = vld [vmem:[%s848_s3 + $0x58] sm:$0xff] }
   0x6   :  { %83 = vmatpush.msra.mxu3 %v57_v1  ;;  %112 = vmatpush.msra.mxu1 %v105_v4 }
   0x8   :  { %113 = vmatpush.msra.mxu1 %v104_v5 }
   0x9   :  { %v59_v2 = vld [vmem:[%s867_s0] sm:$0xff] }
   0xa   :  { %420 = vmatmul.msk.f32.vlgmr.msra.gmra.mxu3 %vm61_vm0, %v59_v2  ;;  %114 = vmatpush.msra.mxu1 %v103_v6 }
   0xb   :  { %22 = vsyncpa [#allocation3], 0  ;;  %v60_v8 = vld [vmem:[%s867_s0 + $0x8] sm:$0xff]  ;;  %v101_v9 = vld [vmem:[%s848_s3 + $0x50] sm:$0xff]  ;;  %s868_s25 = sld [smem:[#allocation6_spill]]  ;;  %s460_s19 = smov [#allocation2]  }
   0xc   :  { %115 = vmatpush.msra.mxu1 %v102_v7  ;;  %v100_v10 = vld [vmem:[%s848_s3 + $0x48] sm:$0xff]  ;;  %v99_v11 = vld [vmem:[%s848_s3 + $0x40] sm:$0xff]  ;;  %v98_v12 = vld [vmem:[%s848_s3 + $0x38] sm:$0xff]  ;;  %s409_s1 = sshll.u32 %s460_s19, 4  ;;  %s411_s21 = sshll.u32 %s862_s17, 4  ;;  %s410_s1 = int_to_ptr.vmem [resolvable:$true] %s409_s1  ;;  %s412_s21 = int_to_ptr.hbm [resolvable:$true] %s411_s21 }
   0xd   :  { %v97_v13 = vld [vmem:[%s848_s3 + $0x30] sm:$0xff]  ;;  %v96_v14 = vld [vmem:[%s848_s3 + $0x28] sm:$0xff]  ;;  %v95_v15 = vld [vmem:[%s848_s3 + $0x20] sm:$0xff] }
   0xe   :  { %116 = vmatpush.msra.mxu1 %v101_v9  ;;  %v94_v16 = vld [vmem:[%s848_s3 + $0x18] sm:$0xff]  ;;  %v93_v17 = vld [vmem:[%s848_s3 + $0x10] sm:$0xff]  ;;  %v92_v18 = vld [vmem:[%s848_s3 + $0x8] sm:$0xff] }
   0xf   :  { %v91_v19 = vld [vmem:[%s848_s3] sm:$0xff]  ;;  %v151_v20 = vld [vmem:[%s850_s5 + $0x78] sm:$0xff]  ;;  %v150_v21 = vld [vmem:[%s850_s5 + $0x70] sm:$0xff] }
  0x10   :  { %117 = vmatpush.msra.mxu1 %v100_v10  ;;  %156 = vmatpush.msra.mxu2 %v151_v20  ;;  %v149_v22 = vld [vmem:[%s850_s5 + $0x68] sm:$0xff]  ;;  %v148_v23 = vld [vmem:[%s850_s5 + $0x60] sm:$0xff]  ;;  %v147_v24 = vld [vmem:[%s850_s5 + $0x58] sm:$0xff] }
  0x11   :  { %v146_v25 = vld [vmem:[%s850_s5 + $0x50] sm:$0xff]  ;;  %v145_v26 = vld [vmem:[%s850_s5 + $0x48] sm:$0xff]  ;;  %v144_v27 = vld [vmem:[%s850_s5 + $0x40] sm:$0xff] }
  0x12   :  { %421 = vmatmul.msk.f32.gmra.mxu3 %vm61_vm0, %v60_v8  ;;  %118 = vmatpush.msra.mxu1 %v99_v11  ;;  %v143_v28 = vld [vmem:[%s850_s5 + $0x38] sm:$0xff]  ;;  %v142_v29 = vld [vmem:[%s850_s5 + $0x30] sm:$0xff]  ;;  %v141_v30 = vld [vmem:[%s850_s5 + $0x28] sm:$0xff] }
  0x13   :  { %157 = vmatpush.msra.mxu2 %v150_v21  ;;  %v140_v31 = vld [vmem:[%s850_s5 + $0x20] sm:$0xff]  ;;  %v139_v32 = vld [vmem:[%s850_s5 + $0x18] sm:$0xff]  ;;  %v138_v35 = vld [vmem:[%s850_s5 + $0x10] sm:$0xff] }
  0x14   :  { %119 = vmatpush.msra.mxu1 %v98_v12  ;;  %v137_v36 = vld [vmem:[%s850_s5 + $0x8] sm:$0xff]  ;;  %v136_v37 = vld [vmem:[%s850_s5] sm:$0xff]  ;;  %v239_v45 = vld [vmem:[%s854_s9 + $0x78] sm:$0xff] }
  0x15   :  { %158 = vmatpush.msra.mxu2 %v149_v22  ;;  %v427_v38 = vld [vmem:[%s849_s4] ss:$0 sm:$0xff]  ;;  %v238_v46 = vld [vmem:[%s854_s9 + $0x70] sm:$0xff]  ;;  %244 = vmatpush.msra.mxu0 %v239_v45  ;;  %v237_v47 = vld [vmem:[%s854_s9 + $0x68] sm:$0xff] }
  0x16   :  { %120 = vmatpush.msra.mxu1 %v97_v13  ;;  %v236_v49 = vld [vmem:[%s854_s9 + $0x60] sm:$0xff]  ;;  %v235_v51 = vld [vmem:[%s854_s9 + $0x58] sm:$0xff]  ;;  %v234_v52 = vld [vmem:[%s854_s9 + $0x50] sm:$0xff] }
  0x17   :  { %159 = vmatpush.msra.mxu2 %v148_v23  ;;  %245 = vmatpush.msra.mxu0 %v238_v46  ;;  %v428_v50 = vld [vmem:[%s851_s6] ss:$0 sm:$0xff]  ;;  %v233_v54 = vld [vmem:[%s854_s9 + $0x48] sm:$0xff]  ;;  %v231_v60 = vld [vmem:[%s854_s9 + $0x38] sm:$0xff] }
  0x18   :  { %121 = vmatpush.msra.mxu1 %v96_v14  ;;  %v232_v56 = vld [vmem:[%s854_s9 + $0x40] sm:$0xff]  ;;  %v230_v62 = vld [vmem:[%s854_s9 + $0x30] sm:$0xff]  ;;  %v229_v2 = vld [vmem:[%s854_s9 + $0x28] sm:$0xff] }
  0x19   :  { %160 = vmatpush.msra.mxu2 %v147_v24  ;;  %246 = vmatpush.msra.mxu0 %v237_v47  ;;  %v429_v58 = vld [vmem:[%s852_s7] ss:$0 sm:$0xff]  ;;  %v227_v7 = vld [vmem:[%s854_s9 + $0x18] sm:$0xff]  ;;  %v226_v8 = vld [vmem:[%s854_s9 + $0x10] sm:$0xff] }
  0x1a   :  { %122 = vmatpush.msra.mxu1 %v95_v15  ;;  %v430_v1 = vld [vmem:[%s853_s8] ss:$0 sm:$0xff]  ;;  %v225_v9 = vld [vmem:[%s854_s9 + $0x8] sm:$0xff]  ;;  %v284_v12 = vld [vmem:[%s856_s11 + $0x78] sm:$0xff] }
  0x1b   :  { %161 = vmatpush.msra.mxu2 %v146_v25  ;;  %247 = vmatpush.msra.mxu0 %v236_v49  ;;  %v228_v4 = vld [vmem:[%s854_s9 + $0x20] sm:$0xff]  ;;  %v194_v10 = vld [vmem:[%s868_s25 + $0x8] sm:$0xff]  ;;  %v283_v13 = vld [vmem:[%s856_s11 + $0x70] sm:$0xff] }
  0x1c   :  { %123 = vmatpush.msra.mxu1 %v94_v16  ;;  %v193_v6 = vld [vmem:[%s868_s25] sm:$0xff]  ;;  %v282_v14 = vld [vmem:[%s856_s11 + $0x68] sm:$0xff]  ;;  %v280_v16 = vld [vmem:[%s856_s11 + $0x58] sm:$0xff] }
  0x1d   :  { %162 = vmatpush.msra.mxu2 %v145_v26  ;;  %248 = vmatpush.msra.mxu0 %v235_v51  ;;  %v224_v11 = vld [vmem:[%s854_s9] sm:$0xff]  ;;  %v276_v20 = vld [vmem:[%s856_s11 + $0x38] sm:$0xff]  ;;  %v275_v21 = vld [vmem:[%s856_s11 + $0x30] sm:$0xff] }
  0x1e   :  { %124 = vmatpush.msra.mxu1 %v93_v17  ;;  %v281_v15 = vld [vmem:[%s856_s11 + $0x60] sm:$0xff]  ;;  %v279_v17 = vld [vmem:[%s856_s11 + $0x50] sm:$0xff]  ;;  %v274_v22 = vld [vmem:[%s856_s11 + $0x28] sm:$0xff] }
  0x1f   :  { %163 = vmatpush.msra.mxu2 %v144_v27  ;;  %249 = vmatpush.msra.mxu0 %v234_v52  ;;  %v273_v23 = vld [vmem:[%s856_s11 + $0x20] sm:$0xff]  ;;  %v272_v24 = vld [vmem:[%s856_s11 + $0x18] sm:$0xff]  ;;  %v271_v27 = vld [vmem:[%s856_s11 + $0x10] sm:$0xff] }
  0x20   :  { %125 = vmatpush.msra.mxu1 %v92_v18  ;;  %v278_v18 = vld [vmem:[%s856_s11 + $0x48] sm:$0xff]  ;;  %v370_v45 = vld [vmem:[%s860_s15 + $0x38] sm:$0xff]  ;;  %v369_v47 = vld [vmem:[%s860_s15 + $0x30] sm:$0xff] }
  0x21   :  { %164 = vmatpush.msra.mxu2 %v143_v28  ;;  %250 = vmatpush.msra.mxu0 %v233_v54  ;;  %v270_v28 = vld [vmem:[%s856_s11 + $0x8] sm:$0xff]  ;;  %v367_v49 = vld [vmem:[%s860_s15 + $0x20] sm:$0xff]  ;;  %v366_v51 = vld [vmem:[%s860_s15 + $0x18] sm:$0xff] }
  0x22   :  { %126 = vmatpush.msra.mxu1 %v91_v19  ;;  %v277_v19 = vld [vmem:[%s856_s11 + $0x40] sm:$0xff] }
  0x23   :  { %165 = vmatpush.msra.mxu2 %v142_v29  ;;  %251 = vmatpush.msra.mxu0 %v232_v56  ;;  %v269_v29 = vld [vmem:[%s856_s11] sm:$0xff] }
  0x25   :  { %166 = vmatpush.msra.mxu2 %v141_v30  ;;  %252 = vmatpush.msra.mxu0 %v231_v60  ;;  %v431_v30 = vld [vmem:[%s855_s10] ss:$0 sm:$0xff]  ;;  %v364_v60 = vld [vmem:[%s860_s15 + $0x8] sm:$0xff] }
  0x27   :  { %167 = vmatpush.msra.mxu2 %v140_v31  ;;  %253 = vmatpush.msra.mxu0 %v230_v62 }
  0x29   :  { %168 = vmatpush.msra.mxu2 %v139_v32  ;;  %254 = vmatpush.msra.mxu0 %v229_v2 }
  0x2b   :  { %169 = vmatpush.msra.mxu2 %v138_v35  ;;  %255 = vmatpush.msra.mxu0 %v228_v4 }
  0x2d   :  { %170 = vmatpush.msra.mxu2 %v137_v36  ;;  %256 = vmatpush.msra.mxu0 %v227_v7 }
  0x2f   :  { %171 = vmatpush.msra.mxu2 %v136_v37  ;;  %257 = vmatpush.msra.mxu0 %v226_v8  ;;  %v378_v37 = vld [vmem:[%s860_s15 + $0x78] sm:$0xff] }
  0x31   :  { %258 = vmatpush.msra.mxu0 %v225_v9 }
  0x33   :  { %259 = vmatpush.msra.mxu0 %v224_v11 }
  0x35   :  { %383 = vmatpush.msrb.mxu0 %v378_v37 }
  0x8d   :  { %v85_v33 = vpop.f32.mrf.mxu3 }
  0x8e   :  { %127 = vmatmul.f32.vlgmr.msra.gmra.mxu1 %v85_v33 }
  0x95   :  { %v88_v34 = vpop.f32.mrf.mxu3 }
  0x96   :  { %130 = vmatmul.f32.gmra.mxu1 %v88_v34 }
 0x10b   :  { %v128_v39 = vpop.f32.mrf.mxu1 }
 0x10c   :  { %v129_v40 = vadd.f32 %v427_v38, %v128_v39  ;;  %v376_v39 = vld [vmem:[%s860_s15 + $0x68] sm:$0xff] }
 0x10e   :  { %v134_v41 = vmax.f32 %v129_v40, 0.0  ;;  %v375_v40 = vld [vmem:[%s860_s15 + $0x60] sm:$0xff] }
 0x110   :  { %172 = vmatmul.f32.vlgmr.msra.gmra.mxu2 %v134_v41  ;;  %v374_v41 = vld [vmem:[%s860_s15 + $0x58] sm:$0xff] }
 0x113   :  { %v131_v42 = vpop.f32.mrf.mxu1 }
 0x114   :  { %v132_v43 = vadd.f32 %v427_v38, %v131_v42  ;;  %v377_v38 = vld [vmem:[%s860_s15 + $0x70] sm:$0xff] }
 0x115   :  { %384 = vmatpush.msrb.mxu0 %v377_v38  ;;  %v373_v42 = vld [vmem:[%s860_s15 + $0x50] sm:$0xff] }
 0x116   :  { %v135_v44 = vmax.f32 %v132_v43, 0.0  ;;  %v372_v43 = vld [vmem:[%s860_s15 + $0x48] sm:$0xff] }
 0x117   :  { %385 = vmatpush.msrb.mxu0 %v376_v39 }
 0x118   :  { %175 = vmatmul.f32.gmra.mxu2 %v135_v44  ;;  %v371_v44 = vld [vmem:[%s860_s15 + $0x40] sm:$0xff] }
 0x119   :  { %386 = vmatpush.msrb.mxu0 %v375_v40 }
 0x11b   :  { %387 = vmatpush.msrb.mxu0 %v374_v41 }
 0x11d   :  { %388 = vmatpush.msrb.mxu0 %v373_v42 }
 0x11f   :  { %389 = vmatpush.msrb.mxu0 %v372_v43 }
 0x121   :  { %390 = vmatpush.msrb.mxu0 %v371_v44 }
 0x123   :  { %391 = vmatpush.msrb.mxu0 %v370_v45 }
 0x125   :  { %392 = vmatpush.msrb.mxu0 %v369_v47 }
 0x193   :  { %v173_v48 = vpop.f32.mrf.mxu2 }
 0x194   :  { %v174_v53 = vadd.f32 %v428_v50, %v173_v48  ;;  %v368_v48 = vld [vmem:[%s860_s15 + $0x28] sm:$0xff] }
 0x195   :  { %393 = vmatpush.msrb.mxu0 %v368_v48 }
 0x196   :  { %v179_v57 = vmax.f32 %v174_v53, 0.0  ;;  %v365_v53 = vld [vmem:[%s860_s15 + $0x10] sm:$0xff] }
 0x197   :  { %394 = vmatpush.msrb.mxu0 %v367_v49 }
 0x198   :  { %v185_v63 = vmul.f32 %v429_v58, %v179_v57 }
 0x199   :  { %395 = vmatpush.msrb.mxu0 %v366_v51 }
 0x19a   :  { %v191_v5 = vadd.f32 %v430_v1, %v185_v63 }
 0x19b   :  { %v176_v55 = vpop.f32.mrf.mxu2  ;;  %396 = vmatpush.msrb.mxu0 %v365_v53 }
 0x19c   :  { %v177_v59 = vadd.f32 %v428_v50, %v176_v55  ;;  %v432_v50 = vld [vmem:[%s857_s12] ss:$0 sm:$0xff] }
 0x19d   :  { %397 = vmatpush.msrb.mxu0 %v364_v60 }
 0x19e   :  { %v180_v61 = vmax.f32 %v177_v59, 0.0  ;;  %v314_v59 = vld [vmem:[%s858_s13] sm:$0xff] }
 0x1a0   :  { %v186_v0 = vmul.f32 %v429_v58, %v180_v61  ;;  %v338_v58 = vld [vmem:[%s859_s14] sm:$0xff] }
 0x1a1   :  { %v363_v61 = vld [vmem:[%s860_s15] sm:$0xff] }
 0x1a2   :  { %v192_v3 = vadd.f32 %v430_v1, %v186_v0  ;;  %398 = vmatpush.msrb.mxu0 %v363_v61  ;;  %v433_v1 = vld [vmem:[%s861_s16] ss:$0 sm:$0xff] }
 0x1a4   :  { %215 = vmatpush.msrb.mxu3 %v192_v3 }
 0x1a6   :  { %216 = vmatpush.msrb.mxu3 %v191_v5 }
 0x1a7   :  { %422 = vmatmul.msk.f32.vlgmr.msrb.gmra.mxu3 %vm61_vm0, %v193_v6 }
 0x1a8   :  { %289 = vmatpush.msra.mxu3 %v284_v12 }
 0x1aa   :  { %290 = vmatpush.msra.mxu3 %v283_v13 }
 0x1ac   :  { %291 = vmatpush.msra.mxu3 %v282_v14 }
 0x1ae   :  { %292 = vmatpush.msra.mxu3 %v281_v15 }
 0x1af   :  { %423 = vmatmul.msk.f32.gmra.mxu3 %vm61_vm0, %v194_v10 }
 0x1b0   :  { %293 = vmatpush.msra.mxu3 %v280_v16 }
 0x1b2   :  { %294 = vmatpush.msra.mxu3 %v279_v17 }
 0x1b4   :  { %295 = vmatpush.msra.mxu3 %v278_v18 }
 0x1b6   :  { %296 = vmatpush.msra.mxu3 %v277_v19 }
 0x1b8   :  { %297 = vmatpush.msra.mxu3 %v276_v20 }
 0x1ba   :  { %298 = vmatpush.msra.mxu3 %v275_v21 }
 0x1bc   :  { %299 = vmatpush.msra.mxu3 %v274_v22 }
 0x1be   :  { %300 = vmatpush.msra.mxu3 %v273_v23 }
 0x1c0   :  { %301 = vmatpush.msra.mxu3 %v272_v24 }
 0x1c2   :  { %302 = vmatpush.msra.mxu3 %v271_v27 }
 0x1c4   :  { %303 = vmatpush.msra.mxu3 %v270_v28 }
 0x1c6   :  { %304 = vmatpush.msra.mxu3 %v269_v29 }
 0x22a   :  { %v218_v25 = vpop.f32.mrf.mxu3 }
 0x22b   :  { %260 = vmatmul.f32.vlgmr.msra.gmra.mxu0 %v218_v25 }
 0x232   :  { %v221_v26 = vpop.f32.mrf.mxu3 }
 0x233   :  { %263 = vmatmul.f32.gmra.mxu0 %v221_v26 }
 0x2a8   :  { %v261_v31 = vpop.f32.mrf.mxu0 }
 0x2a9   :  { %v262_v32 = vadd.f32 %v431_v30, %v261_v31 }
 0x2ab   :  { %v267_v33 = vmax.f32 %v262_v32, 0.0 }
 0x2ad   :  { %305 = vmatmul.f32.vlgmr.msra.gmra.mxu3 %v267_v33 }
 0x2b0   :  { %v264_v34 = vpop.f32.mrf.mxu0 }
 0x2b1   :  { %v265_v35 = vadd.f32 %v431_v30, %v264_v34 }
 0x2b3   :  { %v268_v36 = vmax.f32 %v265_v35, 0.0 }
 0x2b5   :  { %308 = vmatmul.f32.gmra.mxu3 %v268_v36 }
 0x330   :  { %v306_v46 = vpop.f32.mrf.mxu3 }
 0x331   :  { %v307_v54 = vadd.f32 %v432_v50, %v306_v46 }
 0x333   :  { %v312_v57 = vmax.f32 %v307_v54, 0.0 }
 0x338   :  { %v309_v52 = vpop.f32.mrf.mxu3 }
 0x339   :  { %v310_v55 = vadd.f32 %v432_v50, %v309_v52 }
 0x33b   :  { %v313_v56 = vmax.f32 %v310_v55, 0.0 }
 0x33d   :  { %332 = vmatpush.msrb.mxu1 %v313_v56  ;;  %356 = vmatpush.msrb.mxu2 %v313_v56 }
 0x33f   :  { %333 = vmatpush.msrb.mxu1 %v312_v57  ;;  %357 = vmatpush.msrb.mxu2 %v312_v57 }
 0x340   :  { %425 = vmatmul.msk.f32.vlgmr.msrb.gmra.mxu2 %vm61_vm0, %v338_v58  ;;  %424 = vmatmul.msk.f32.vlgmr.msrb.gmra.mxu1 %vm61_vm0, %v314_v59 }
 0x3bd   :  { %v335_v62 = vpop.f32.mrf.mxu1 }
 0x3c3   :  { %v359_v63 = vpop.f32.mrf.mxu2 }
 0x3c4   :  { %v362_v0 = vmul.f32 %v359_v63, %v335_v62 }
 0x3c6   :  { %399 = vmatmul.f32.vlgmr.msrb.gmra.mxu0 %v362_v0 }
 0x443   :  { %v400_v2 = vpop.f32.mrf.mxu0 }
 0x444   :  { %v401_v3 = vadd.f32 %v433_v1, %v400_v2 }
 0x446   :  { %403 = vst [vmem:[#allocation2] sm:$0xff] %v401_v3 }
 0x447   :  { %414 = dma.vmem_to_hbm [thread:$0]  %s410_s1, 128, %s412_s21, [#allocation3]  }
 0x448   :  { %458 = dma.done.wait [#allocation3], 128  }
 0x449   :  { %459 = vsyncadd [#allocation3], 4294967168 }
 0x44a   :  { %419 = vsyncpa [#allocation3], 1 }

</bundles_post_ra>
